<compile_context>
chip_gen: v6e
topology: v6e:2x2x1
jax: 0.10.0
libtpu: 0.0.40
codegen_flags: <defaults>
</compile_context>

<pallas_src>
import jax
import jax.numpy as jnp
from jax.experimental import pallas as pl
from jax.experimental.pallas import tpu as pltpu

n_classes = 1


def _lr_kernel(x_ref, w_ref, o_ref):
    # MXU matmul (f32 accumulate), then sigmoid on the VPU/EUP.
    logits = jnp.dot(x_ref[...], w_ref[...], preferred_element_type=jnp.float32)
    o_ref[...] = jax.nn.sigmoid(logits).astype(o_ref.dtype)


def lr_forward(x, weight, *, block_rows=1024):
    """x: (B, IN_CH) float32, weight: (n_classes, IN_CH) float32 (PyTorch layout)."""
    x = x.astype(jnp.float32)
    w_t = weight.astype(jnp.float32).T  # (IN_CH, n_classes)
    B, IN_CH = x.shape

    # --- pick a batch tile -------------------------------------------------
    # Cap the double-buffered x tile (2 * TB * IN_CH * 4 bytes) at ~8 MiB so it
    # fits comfortably within the scoped-VMEM budget of every generation
    # (v5e 16 MiB default scoped, v7x 64 MiB total).
    vmem_budget_bytes = 8 * 1024 * 1024
    max_rows = max(8, (vmem_budget_bytes // (2 * IN_CH * 4)) // 8 * 8)
    tb = min(block_rows, max_rows)
    # Don't use a block larger than the (8-aligned) batch itself.
    tb = min(tb, pl.cdiv(B, 8) * 8)
    tb = max(8, (tb // 8) * 8)

    # --- pad the batch so every block is full ------------------------------
    padded_b = pl.cdiv(B, tb) * tb
    if padded_b != B:
        x = jnp.pad(x, ((0, padded_b - B), (0, 0)))

    grid = (padded_b // tb,)

    cost = pl.CostEstimate(
        flops=2 * padded_b * IN_CH * n_classes,
        transcendentals=padded_b * n_classes,
        bytes_accessed=(padded_b * IN_CH * 4
                        + padded_b * n_classes * 4
                        + IN_CH * n_classes * 4),
    )

    out = pl.pallas_call(
        _lr_kernel,
        out_shape=jax.ShapeDtypeStruct((padded_b, n_classes), jnp.float32),
        grid_spec=pl.GridSpec(
            grid=grid,
            in_specs=[
                # x: one batch tile per grid step.
                pl.BlockSpec((tb, IN_CH), lambda i: (i, 0)),
                # weight: constant block index -> DMA'd once, stays resident.
                pl.BlockSpec((IN_CH, n_classes), lambda i: (0, 0)),
            ],
            out_specs=pl.BlockSpec((tb, n_classes), lambda i: (i, 0)),
        ),
        compiler_params=pltpu.CompilerParams(
            dimension_semantics=("parallel",),
        ),
        cost_estimate=cost,
    )(x, w_t)

    return out[:B] if padded_b != B else out


if __name__ == "__main__":
    key = jax.random.PRNGKey(0)
    kx, kw, kx2 = jax.random.split(key, 3)

    B, IN_CH = 8, 32
    x = jax.random.normal(kx, (B, IN_CH), dtype=jnp.float32)
    # Deterministic init mimicking nn.Linear's uniform(-1/sqrt(IN_CH), 1/sqrt(IN_CH))
    bound = 1.0 / jnp.sqrt(jnp.float32(IN_CH))
    weight = jax.random.uniform(
        kw, (n_classes, IN_CH), dtype=jnp.float32, minval=-bound, maxval=bound
    )

    out = lr_forward(x, weight)
    out = jax.block_until_ready(out)

    ref = jax.nn.sigmoid(x @ weight.T)
    assert out.shape == (B, n_classes)
    assert jnp.allclose(out, ref, atol=1e-5), "mismatch vs reference"

    # Also exercise the ragged-batch (padded) path with a batch not divisible by 8.
    B2 = 20
    x2 = jax.random.normal(kx2, (B2, IN_CH), dtype=jnp.float32)
    out2 = jax.block_until_ready(lr_forward(x2, weight))
    ref2 = jax.nn.sigmoid(x2 @ weight.T)
    assert out2.shape == (B2, n_classes)
    assert jnp.allclose(out2, ref2, atol=1e-5), "mismatch vs reference (padded path)"

    print("KERNEL_OK")
</pallas_src>

<mosaic_0001>
module attributes {stable_mosaic.version = 11 : i64} {
  func.func @_lr_kernel(%arg0: i32, %arg1: memref<8x32xf32, #tpu.memory_space<vmem>>, %arg2: memref<32x1xf32, #tpu.memory_space<vmem>>, %arg3: memref<8x1xf32, #tpu.memory_space<vmem>>) attributes {dimension_semantics = [#tpu.dimension_semantics<parallel>], iteration_bounds = array<i64: 1>, scalar_prefetch = 0 : i64, scratch_operands = 0 : i64, tpu.core_type = #tpu.core_type<tc>, window_params = [{transform_indices = @transform_0, window_bounds = array<i64: 8, 32>}, {pipeline_mode = #tpu.pipeline_mode<synchronous>, transform_indices = @transform_1, window_bounds = array<i64: 32, 1>}, {transform_indices = @transform_2, window_bounds = array<i64: 8, 1>}]} {
    %c0 = arith.constant 0 : index
    %c0_0 = arith.constant 0 : index
    %0 = vector.load %arg1[%c0, %c0_0] : memref<8x32xf32, #tpu.memory_space<vmem>>, vector<8x32xf32>
    %c0_1 = arith.constant 0 : index
    %c0_2 = arith.constant 0 : index
    %1 = vector.load %arg2[%c0_1, %c0_2] : memref<32x1xf32, #tpu.memory_space<vmem>>, vector<32x1xf32>
    %cst = arith.constant dense<0.000000e+00> : vector<8x1xf32>
    %2 = tpu.matmul %0, %1, %cst {dimension_numbers = #tpu.dot_dimension_numbers<[1], [0], [0], [1], [0, 0, 1, 1], [], []>} : vector<8x32xf32>, vector<32x1xf32>, vector<8x1xf32> -> vector<8x1xf32>
    %3 = arith.negf %2 : vector<8x1xf32>
    %4 = math.exp %3 : vector<8x1xf32>
    %cst_3 = arith.constant 1.000000e+00 : f32
    %5 = vector.broadcast %cst_3 : f32 to vector<8x1xf32>
    %6 = arith.addf %5, %4 : vector<8x1xf32>
    %7 = arith.divf %5, %6 : vector<8x1xf32>
    %c0_4 = arith.constant 0 : index
    %c0_5 = arith.constant 0 : index
    %8 = vector.load %arg3[%c0_4, %c0_5] : memref<8x1xf32, #tpu.memory_space<vmem>>, vector<8x1xf32>
    tpu.vector_store %arg3[%c0_4, %c0_5], %7 {strides = array<i32>} : memref<8x1xf32, #tpu.memory_space<vmem>>, vector<8x1xf32>,
    return
  }
  func.func @transform_0(%arg0: i32) -> (i32, i32) {
    %c0_i32 = arith.constant 0 : i32
    %c0_i32_0 = arith.constant 0 : i32
    return %arg0, %c0_i32 : i32, i32
  }
  func.func @transform_1(%arg0: i32) -> (i32, i32) {
    %c0_i32 = arith.constant 0 : i32
    %c0_i32_0 = arith.constant 0 : i32
    %c0_i32_1 = arith.constant 0 : i32
    return %c0_i32, %c0_i32_0 : i32, i32
  }
  func.func @transform_2(%arg0: i32) -> (i32, i32) {
    %c0_i32 = arith.constant 0 : i32
    %c0_i32_0 = arith.constant 0 : i32
    return %arg0, %c0_i32 : i32, i32
  }
}

</mosaic_0001>

<bundles_post_ra>
// kernel: tpu_custom_call.1
= control target key start
LH: loop header
LB: loop body
LE: loop exit
PB: predicated region body
PF: predicated region fallthrough
CT: control target
= control target key end

     0   :  { %v126_v0 = vmov 0.0   ;;  %vm127_vm0 = vmmov 0   ;;  %vm16_vm1 = vcmask 261120   ;;  %vm96_vm2 = vcmask 7168   ;;  %s161_s1 = inlined_call_operand.vmem [shape: f32[32,1], index: 1, kind: input, shape index: {}]   ;;  %s162_s0 = inlined_call_operand.vmem [shape: f32[8,32], index: 0, kind: input, shape index: {}]   ;;  %s163_s2 = inlined_call_operand.vmem [shape: f32[8,1], index: 2, kind: output, shape index: {}]  }
   0x1   :  { %109 = vmatprep.subr.mxu0 %v126_v0  ;;  %v15_v1 = vld [vmem:[%s161_s1 + $0x18] sm:$0xff]  ;;  %v14_v2 = vld [vmem:[%s161_s1 + $0x10] sm:$0xff]  ;;  %117 = vmatprep.mubr.msk.f32.mxu0 %vm127_vm0, %v126_v0  ;;  %v13_v3 = vld [vmem:[%s161_s1 + $0x8] sm:$0xff] }
   0x2   :  { %110 = vmatpush3.msra.mxu0 %v15_v1  ;;  %v12_v4 = vld [vmem:[%s161_s1] sm:$0xff] }
   0x3   :  { %111 = vmatprep.subr.mxu0 %v126_v0  ;;  %v11_v5 = vld [vmem:[%s162_s0] sm:$0xff] }
   0x4   :  { %112 = vmatpush3.msra.mxu0 %v14_v2 }
   0x5   :  { %113 = vmatprep.subr.mxu0 %v126_v0 }
   0x6   :  { %114 = vmatpush3.msra.mxu0 %v13_v3 }
   0x7   :  { %115 = vmatprep.subr.mxu0 %v126_v0 }
   0x8   :  { %116 = vmatpush3.msra.mxu0 %v12_v4 }
   0x9   :  { %118 = vmatmul.mubr.msk.f32.vlgmr.msra.gmra.mxu0 %vm16_vm1, %v11_v5 }
  0xc9   :  { %v86_v6 = vpop.f32.mrf.mxu0 }
  0xca   :  { %v103_v7 = vmul.f32 -1.442695, %v86_v6 }
  0xcb   :  { %v119_v8 = vpop.f32.mrf.mxu0 }
  0xcc   :  { %122 = vpow2.f32 %v103_v7 }
  0xd9   :  { %v123_v9 = vpop.eup %122 }
  0xda   :  { %v93_v10 = vadd.f32 1.0, %v123_v9 }
  0xdc   :  { %124 = vrcp.f32 %v93_v10 }
  0xe9   :  { %v125_v11 = vpop.eup %124 }
  0xea   :  { %97 = vst.msk [vmem:[%s163_s2] sm:$0xff] %vm96_vm2, %v125_v11 }

</bundles_post_ra>
